<compile_context>
chip_gen: v6e
topology: v6e:2x2x1
jax: 0.10.0
libtpu: 0.0.40
codegen_flags: <defaults>
</compile_context>

<pallas_src>
import jax
import jax.numpy as jnp
from jax.experimental import pallas as pl
from jax.experimental.pallas import tpu as pltpu


def mlp_kernel(x_ref, w1_ref, b1_ref, w2_ref, b2_ref, w3_ref, b3_ref, o_ref):
    # Layer 1: Linear(204 -> 256) + ReLU. bf16 operands, fp32 accumulate.
    # Ragged K=204 contraction is masked by Mosaic; no explicit padding needed.
    x = x_ref[...].astype(jnp.bfloat16)
    h1 = jnp.dot(x, w1_ref[...], preferred_element_type=jnp.float32)
    h1 = jnp.maximum(h1 + b1_ref[...], 0.0)
    # Layer 2: Linear(256 -> 256) + ReLU.
    h2 = jnp.dot(h1.astype(jnp.bfloat16), w2_ref[...],
                 preferred_element_type=jnp.float32)
    h2 = jnp.maximum(h2 + b2_ref[...], 0.0)
    # Layer 3: Linear(256 -> 192), no activation. Store 192-wide directly.
    out = jnp.dot(h2.astype(jnp.bfloat16), w3_ref[...],
                  preferred_element_type=jnp.float32)
    o_ref[...] = (out + b3_ref[...]).astype(o_ref.dtype)


def prepare_params(params):
    """One-time conversion of weights to kernel layout (bf16 matmul operands,
    fp32 biases). Do this once and reuse; avoids per-call convert ops."""
    w1, b1, w2, b2, w3, b3 = params
    return (w1.astype(jnp.bfloat16), b1.astype(jnp.float32),
            w2.astype(jnp.bfloat16), b2.astype(jnp.float32),
            w3.astype(jnp.bfloat16), b3.astype(jnp.float32))


def overcooked_predictor(x, prepped_params, tile_b=1024):
    """x: (B, 204) float32 -> (B, 192) float32. prepped_params from prepare_params()."""
    w1, b1, w2, b2, w3, b3 = prepped_params
    B, in_dim = x.shape
    hidden = w1.shape[1]
    out_dim = w3.shape[1]

    # --- Batch tile selection. ---
    if B > tile_b:
        tb = tile_b
    elif B >= 16:
        # Split into >=2 grid steps so v7x's second TensorCore is not idle;
        # keep 8-row alignment (f32 sublane tile).
        half = -(-B // 2)
        tb = -(-half // 8) * 8
    else:
        tb = max(8, -(-B // 8) * 8)
    grid = (pl.cdiv(B, tb),)  # ragged edge blocks handled (masked) by Pallas

    # --- Cost estimate (helps XLA schedule around the custom call). ---
    w_elems = in_dim * hidden + hidden * hidden + hidden * out_dim
    flops = 2 * B * w_elems
    bytes_accessed = 4 * B * (in_dim + out_dim) + 2 * w_elems + 4 * (2 * hidden + out_dim)

    # Default scoped VMEM (16 MiB on v5e, 32 MiB on v6e/v7x) is plenty for
    # tile_b<=1024 (~7 MiB working set). Only raise the limit for huge tiles.
    cp_kwargs = dict(dimension_semantics=("parallel",))
    if tb >= 2048:
        cp_kwargs["vmem_limit_bytes"] = 48 * 1024 * 1024

    out = pl.pallas_call(
        mlp_kernel,
        out_shape=jax.ShapeDtypeStruct((B, out_dim), jnp.float32),
        grid=grid,
        in_specs=[
            pl.BlockSpec((tb, in_dim), lambda i: (i, 0)),        # x tile (pipelined, f32)
            pl.BlockSpec((in_dim, hidden), lambda i: (0, 0)),    # W1 (VMEM-resident)
            pl.BlockSpec((1, hidden), lambda i: (0, 0)),         # b1
            pl.BlockSpec((hidden, hidden), lambda i: (0, 0)),    # W2
            pl.BlockSpec((1, hidden), lambda i: (0, 0)),         # b2
            pl.BlockSpec((hidden, out_dim), lambda i: (0, 0)),   # W3
            pl.BlockSpec((1, out_dim), lambda i: (0, 0)),        # b3
        ],
        out_specs=pl.BlockSpec((tb, out_dim), lambda i: (i, 0)),  # direct 192-wide store
        compiler_params=pltpu.CompilerParams(**cp_kwargs),
        cost_estimate=pl.CostEstimate(flops=flops, transcendentals=0,
                                      bytes_accessed=bytes_accessed),
    )(x, w1, b1, w2, b2, w3, b3)
    return out


def init_params(key, input_dim=204, hidden=256, output_dim=192):
    """Deterministic init mimicking PyTorch nn.Linear default
    (uniform(-1/sqrt(fan_in), 1/sqrt(fan_in)) for both W and b)."""
    dims = [(input_dim, hidden), (hidden, hidden), (hidden, output_dim)]
    params = []
    for i, (fan_in, fan_out) in enumerate(dims):
        kw, kb = jax.random.split(jax.random.fold_in(key, i))
        bound = 1.0 / (fan_in ** 0.5)
        w = jax.random.uniform(kw, (fan_in, fan_out), jnp.float32,
                               minval=-bound, maxval=bound)
        b = jax.random.uniform(kb, (1, fan_out), jnp.float32,
                               minval=-bound, maxval=bound)
        params += [w, b]
    return tuple(params)


def reference_mlp(x, params):
    w1, b1, w2, b2, w3, b3 = params
    h = jnp.maximum(x @ w1 + b1, 0.0)
    h = jnp.maximum(h @ w2 + b2, 0.0)
    return h @ w3 + b3


if __name__ == "__main__":
    key = jax.random.PRNGKey(0)
    k_x, k_p = jax.random.split(key)

    IN_DIM, OUT_DIM = 204, 192
    params = init_params(k_p, input_dim=IN_DIM, hidden=256, output_dim=OUT_DIM)
    prepped = prepare_params(params)   # one-time weight layout conversion

    # Small batch (single grid step, 8-row tile, ragged edge on rows).
    B = 8
    x = jax.random.normal(k_x, (B, IN_DIM), jnp.float32)
    out = jax.block_until_ready(overcooked_predictor(x, prepped))
    ref = reference_mlp(x, params)
    assert out.shape == (B, OUT_DIM), out.shape
    # bf16 matmul operands -> relaxed tolerance vs fp32 reference.
    assert jnp.allclose(out, ref, atol=3e-2, rtol=3e-2), "mismatch vs reference (B=8)"

    # Batch that exercises >=2 grid steps + ragged last block (260 rows, tb=136).
    B2 = 260
    x2 = jax.random.normal(jax.random.fold_in(k_x, 1), (B2, IN_DIM), jnp.float32)
    out2 = jax.block_until_ready(overcooked_predictor(x2, prepped))
    ref2 = reference_mlp(x2, params)
    assert out2.shape == (B2, OUT_DIM), out2.shape
    assert jnp.allclose(out2, ref2, atol=3e-2, rtol=3e-2), "mismatch vs reference (B=260)"

    print("KERNEL_OK")
</pallas_src>

<mosaic_0001>
module attributes {stable_mosaic.version = 11 : i64} {
  func.func @mlp_kernel(%arg0: i32, %arg1: memref<8x204xf32, #tpu.memory_space<vmem>>, %arg2: memref<204x256xbf16, #tpu.memory_space<vmem>>, %arg3: memref<1x256xf32, #tpu.memory_space<vmem>>, %arg4: memref<256x256xbf16, #tpu.memory_space<vmem>>, %arg5: memref<1x256xf32, #tpu.memory_space<vmem>>, %arg6: memref<256x192xbf16, #tpu.memory_space<vmem>>, %arg7: memref<1x192xf32, #tpu.memory_space<vmem>>, %arg8: memref<8x192xf32, #tpu.memory_space<vmem>>) attributes {dimension_semantics = [#tpu.dimension_semantics<parallel>], iteration_bounds = array<i64: 1>, scalar_prefetch = 0 : i64, scratch_operands = 0 : i64, tpu.core_type = #tpu.core_type<tc>, window_params = [{transform_indices = @transform_0, window_bounds = array<i64: 8, 204>}, {pipeline_mode = #tpu.pipeline_mode<synchronous>, transform_indices = @transform_1, window_bounds = array<i64: 204, 256>}, {pipeline_mode = #tpu.pipeline_mode<synchronous>, transform_indices = @transform_2, window_bounds = array<i64: 1, 256>}, {pipeline_mode = #tpu.pipeline_mode<synchronous>, transform_indices = @transform_3, window_bounds = array<i64: 256, 256>}, {pipeline_mode = #tpu.pipeline_mode<synchronous>, transform_indices = @transform_4, window_bounds = array<i64: 1, 256>}, {pipeline_mode = #tpu.pipeline_mode<synchronous>, transform_indices = @transform_5, window_bounds = array<i64: 256, 192>}, {pipeline_mode = #tpu.pipeline_mode<synchronous>, transform_indices = @transform_6, window_bounds = array<i64: 1, 192>}, {transform_indices = @transform_7, window_bounds = array<i64: 8, 192>}]} {
    %c0 = arith.constant 0 : index
    %c0_0 = arith.constant 0 : index
    %0 = vector.load %arg1[%c0, %c0_0] : memref<8x204xf32, #tpu.memory_space<vmem>>, vector<8x204xf32>
    %1 = arith.truncf %0 : vector<8x204xf32> to vector<8x204xbf16>
    %c0_1 = arith.constant 0 : index
    %c0_2 = arith.constant 0 : index
    %2 = vector.load %arg2[%c0_1, %c0_2] : memref<204x256xbf16, #tpu.memory_space<vmem>>, vector<204x256xbf16>
    %cst = arith.constant dense<0.000000e+00> : vector<8x256xf32>
    %3 = tpu.matmul %1, %2, %cst {dimension_numbers = #tpu.dot_dimension_numbers<[1], [0], [0], [1], [0, 0, 1, 1], [], []>} : vector<8x204xbf16>, vector<204x256xbf16>, vector<8x256xf32> -> vector<8x256xf32>
    %c0_3 = arith.constant 0 : index
    %c0_4 = arith.constant 0 : index
    %4 = vector.load %arg3[%c0_3, %c0_4] : memref<1x256xf32, #tpu.memory_space<vmem>>, vector<1x256xf32>
    %5 = vector.broadcast %4 : vector<1x256xf32> to vector<8x256xf32>
    %6 = arith.addf %3, %5 : vector<8x256xf32>
    %cst_5 = arith.constant 0.000000e+00 : f32
    %7 = vector.broadcast %cst_5 : f32 to vector<8x256xf32>
    %8 = arith.maximumf %6, %7 : vector<8x256xf32>
    %9 = arith.truncf %8 : vector<8x256xf32> to vector<8x256xbf16>
    %c0_6 = arith.constant 0 : index
    %c0_7 = arith.constant 0 : index
    %10 = vector.load %arg4[%c0_6, %c0_7] : memref<256x256xbf16, #tpu.memory_space<vmem>>, vector<256x256xbf16>
    %cst_8 = arith.constant dense<0.000000e+00> : vector<8x256xf32>
    %11 = tpu.matmul %9, %10, %cst_8 {dimension_numbers = #tpu.dot_dimension_numbers<[1], [0], [0], [1], [0, 0, 1, 1], [], []>} : vector<8x256xbf16>, vector<256x256xbf16>, vector<8x256xf32> -> vector<8x256xf32>
    %c0_9 = arith.constant 0 : index
    %c0_10 = arith.constant 0 : index
    %12 = vector.load %arg5[%c0_9, %c0_10] : memref<1x256xf32, #tpu.memory_space<vmem>>, vector<1x256xf32>
    %13 = vector.broadcast %12 : vector<1x256xf32> to vector<8x256xf32>
    %14 = arith.addf %11, %13 : vector<8x256xf32>
    %cst_11 = arith.constant 0.000000e+00 : f32
    %15 = vector.broadcast %cst_11 : f32 to vector<8x256xf32>
    %16 = arith.maximumf %14, %15 : vector<8x256xf32>
    %17 = arith.truncf %16 : vector<8x256xf32> to vector<8x256xbf16>
    %c0_12 = arith.constant 0 : index
    %c0_13 = arith.constant 0 : index
    %18 = vector.load %arg6[%c0_12, %c0_13] : memref<256x192xbf16, #tpu.memory_space<vmem>>, vector<256x192xbf16>
    %cst_14 = arith.constant dense<0.000000e+00> : vector<8x192xf32>
    %19 = tpu.matmul %17, %18, %cst_14 {dimension_numbers = #tpu.dot_dimension_numbers<[1], [0], [0], [1], [0, 0, 1, 1], [], []>} : vector<8x256xbf16>, vector<256x192xbf16>, vector<8x192xf32> -> vector<8x192xf32>
    %c0_15 = arith.constant 0 : index
    %c0_16 = arith.constant 0 : index
    %20 = vector.load %arg7[%c0_15, %c0_16] : memref<1x192xf32, #tpu.memory_space<vmem>>, vector<1x192xf32>
    %21 = vector.broadcast %20 : vector<1x192xf32> to vector<8x192xf32>
    %22 = arith.addf %19, %21 : vector<8x192xf32>
    %c0_17 = arith.constant 0 : index
    %c0_18 = arith.constant 0 : index
    %23 = vector.load %arg8[%c0_17, %c0_18] : memref<8x192xf32, #tpu.memory_space<vmem>>, vector<8x192xf32>
    tpu.vector_store %arg8[%c0_17, %c0_18], %22 {strides = array<i32>} : memref<8x192xf32, #tpu.memory_space<vmem>>, vector<8x192xf32>,
    return
  }
  func.func @transform_0(%arg0: i32) -> (i32, i32) {
    %c0_i32 = arith.constant 0 : i32
    %c0_i32_0 = arith.constant 0 : i32
    return %arg0, %c0_i32 : i32, i32
  }
  func.func @transform_1(%arg0: i32) -> (i32, i32) {
    %c0_i32 = arith.constant 0 : i32
    %c0_i32_0 = arith.constant 0 : i32
    %c0_i32_1 = arith.constant 0 : i32
    return %c0_i32, %c0_i32_0 : i32, i32
  }
  func.func @transform_2(%arg0: i32) -> (i32, i32) {
    %c0_i32 = arith.constant 0 : i32
    %c0_i32_0 = arith.constant 0 : i32
    %c0_i32_1 = arith.constant 0 : i32
    return %c0_i32, %c0_i32_0 : i32, i32
  }
  func.func @transform_3(%arg0: i32) -> (i32, i32) {
    %c0_i32 = arith.constant 0 : i32
    %c0_i32_0 = arith.constant 0 : i32
    %c0_i32_1 = arith.constant 0 : i32
    return %c0_i32, %c0_i32_0 : i32, i32
  }
  func.func @transform_4(%arg0: i32) -> (i32, i32) {
    %c0_i32 = arith.constant 0 : i32
    %c0_i32_0 = arith.constant 0 : i32
    %c0_i32_1 = arith.constant 0 : i32
    return %c0_i32, %c0_i32_0 : i32, i32
  }
  func.func @transform_5(%arg0: i32) -> (i32, i32) {
    %c0_i32 = arith.constant 0 : i32
    %c0_i32_0 = arith.constant 0 : i32
    %c0_i32_1 = arith.constant 0 : i32
    return %c0_i32, %c0_i32_0 : i32, i32
  }
  func.func @transform_6(%arg0: i32) -> (i32, i32) {
    %c0_i32 = arith.constant 0 : i32
    %c0_i32_0 = arith.constant 0 : i32
    %c0_i32_1 = arith.constant 0 : i32
    return %c0_i32, %c0_i32_0 : i32, i32
  }
  func.func @transform_7(%arg0: i32) -> (i32, i32) {
    %c0_i32 = arith.constant 0 : i32
    %c0_i32_0 = arith.constant 0 : i32
    return %arg0, %c0_i32 : i32, i32
  }
}

</mosaic_0001>

<bundles_post_ra>
// kernel: tpu_custom_call.1
= control target key start
LH: loop header
LB: loop body
LE: loop exit
PB: predicated region body
PF: predicated region fallthrough
CT: control target
= control target key end

     0   :  { %12 = vsyncpa [#allocation3], 0  ;;  %s1312_s0 = inlined_call_operand.vmem [shape: f32[8,204], index: 0, kind: input, shape index: {}]   ;;  %s1313_s1 = inlined_call_operand.hbm [shape: bf16[204,256], index: 1, kind: input, shape index: {}]   ;;  %s1314_s2 = inlined_call_operand.vmem [shape: f32[1,256], index: 2, kind: input, shape index: {}]   ;;  %s1315_s3 = inlined_call_operand.vmem [shape: bf16[256,256], index: 3, kind: input, shape index: {}]   ;;  %s1316_s4 = inlined_call_operand.vmem [shape: f32[1,256], index: 4, kind: input, shape index: {}]   ;;  %s1317_s5 = inlined_call_operand.vmem [shape: bf16[256,192], index: 5, kind: input, shape index: {}]   ;;  %s1318_s6 = inlined_call_operand.vmem [shape: f32[1,192], index: 6, kind: input, shape index: {}]   ;;  %s1319_s7 = inlined_call_operand.hbm [shape: f32[8,192], index: 7, kind: output, shape index: {}]  }
   0x1   :  { %13 = vsyncpa [#allocation4], 0  ;;  %s1055_s24 = smov [#allocation2]  }
   0x2   :  { %s21_s25 = sshll.u32 %s1055_s24, 4  ;;  %s22_s25 = int_to_ptr.vmem [resolvable:$true] %s21_s25 }
   0x3   :  { %s1019_s26 = scalar_lea.vmem %s22_s25, 3328  ;;  %p1024_p1 = scmp.lt.s32.totalorder %s22_s25, %s22_s25 }
   0x4   :  { %p1020_p0 = scmp.ne.s32.totalorder %s22_s25, %s1019_s26  ;;  %p1025_p2 = scmp.lt.s32.totalorder %s1019_s26, %s1019_s26 }
   0x6   :  { %p1026_p3 = por %p1025_p2, %p1024_p1 }
   0x8   :  { %p1027_p4 = pnand %p1026_p3, %p1020_p0 }
   0xa   :  { %1030 = shalt.err (!%p1027_p4)
}
   0xb   :  { %s1056_s27 = smov 128   ;;  %s1057_s28 = smov 8  }
   0xc   :  { %27 = dma.hbm_to_vmem [thread:$0]  %s1313_s1, 3328, %s22_s25, [#allocation3], %s1056_s27, %s1056_s27, %s1057_s28  }
   0xd   :  { %1051 = dma.done.wait [#allocation3], 3328  }
   0xe   :  { %1052 = vsyncadd [#allocation3], 4294963968  ;;  %v876_v0 = vld [vmem:[#allocation2 + $0x74] ss:$8 sps:$4 sm:$0xff]   ;;  %v878_v1 = vld [vmem:[#allocation2 + $0x70] ss:$8 sps:$4 sm:$0xff]  }
   0xf   :  { %223 = vmatprep.subr.bf16.mxu0 %v876_v0  ;;  %v879_v2 = vld [vmem:[#allocation2 + $0x64] ss:$8 sps:$4 sm:$0xff]   ;;  %v881_v3 = vld [vmem:[#allocation2 + $0x60] ss:$8 sps:$4 sm:$0xff]   ;;  %v882_v4 = vld [vmem:[#allocation2 + $0x54] ss:$8 sps:$4 sm:$0xff]  }
  0x10   :  { %224 = vmatpush1.bf16.msra.mxu0 %v878_v1  ;;  %v884_v5 = vld [vmem:[#allocation2 + $0x50] ss:$8 sps:$4 sm:$0xff]   ;;  %v885_v6 = vld [vmem:[#allocation2 + $0x44] ss:$8 sps:$4 sm:$0xff]   ;;  %v887_v7 = vld [vmem:[#allocation2 + $0x40] ss:$8 sps:$4 sm:$0xff]  }
  0x11   :  { %225 = vmatprep.subr.bf16.mxu0 %v879_v2  ;;  %v888_v8 = vld [vmem:[#allocation2 + $0x34] ss:$8 sps:$4 sm:$0xff]   ;;  %v890_v9 = vld [vmem:[#allocation2 + $0x30] ss:$8 sps:$4 sm:$0xff]   ;;  %v891_v10 = vld [vmem:[#allocation2 + $0x24] ss:$8 sps:$4 sm:$0xff]  }
  0x12   :  { %v893_v11 = vld [vmem:[#allocation2 + $0x20] ss:$8 sps:$4 sm:$0xff]   ;;  %vm212_vm0 = vcmask 621568   ;;  %v915_v14 = vld [vmem:[%s1315_s3 + $0x74] ss:$8 sps:$4 sm:$0xff]   ;;  %vm216_vm1 = vcmask 1045504  }
  0x13   :  { %v43_v12 = vld [vmem:[%s1312_s0 + $0x8] sm:$0xff]  ;;  %v917_v15 = vld [vmem:[%s1315_s3 + $0x70] ss:$8 sps:$4 sm:$0xff]   ;;  %v894_v16 = vld [vmem:[#allocation2 + $0x14] ss:$8 sps:$4 sm:$0xff]   ;;  %472 = vmatprep.subr.bf16.mxu1 %v915_v14  ;;  %vm763_vm2 = vcmask 523264  }
  0x14   :  { %226 = vmatpush1.bf16.msra.mxu0 %v881_v3  ;;  %v45_v13 = vpack.c.bf16 %v43_v12, %v43_v12  ;;  %v918_v17 = vld [vmem:[%s1315_s3 + $0x64] ss:$8 sps:$4 sm:$0xff]   ;;  %v896_v18 = vld [vmem:[#allocation2 + $0x10] ss:$8 sps:$4 sm:$0xff]   ;;  %473 = vmatpush1.bf16.msra.mxu1 %v917_v15  ;;  %v920_v19 = vld [vmem:[%s1315_s3 + $0x60] ss:$8 sps:$4 sm:$0xff]  }
  0x15   :  { %227 = vmatprep.subr.bf16.mxu0 %v882_v4  ;;  %474 = vmatprep.subr.bf16.mxu1 %v918_v17  ;;  %v921_v20 = vld [vmem:[%s1315_s3 + $0x54] ss:$8 sps:$4 sm:$0xff]   ;;  %v897_v21 = vld [vmem:[#allocation2 + $0x4] ss:$8 sps:$4 sm:$0xff]   ;;  %v899_v22 = vld [vmem:[#allocation2] ss:$8 sps:$4 sm:$0xff]  }
  0x16   :  { %807 = vmatprep.mubr.msk.bf16.mxu0 %vm212_vm0, %v45_v13  ;;  %v900_v23 = vld [vmem:[#allocation2 + $0xc4] ss:$8 sps:$4 sm:$0x3f]   ;;  %v923_v24 = vld [vmem:[%s1315_s3 + $0x50] ss:$8 sps:$4 sm:$0xff]  }
  0x17   :  { %v924_v25 = vld [vmem:[%s1315_s3 + $0x44] ss:$8 sps:$4 sm:$0xff]   ;;  %v902_v26 = vld [vmem:[#allocation2 + $0xc0] ss:$8 sps:$4 sm:$0x3f]  }
  0x18   :  { %228 = vmatpush1.bf16.msra.mxu0 %v884_v5  ;;  %475 = vmatpush1.bf16.msra.mxu1 %v920_v19  ;;  %v926_v27 = vld [vmem:[%s1315_s3 + $0x40] ss:$8 sps:$4 sm:$0xff]   ;;  %v927_v28 = vld [vmem:[%s1315_s3 + $0x34] ss:$8 sps:$4 sm:$0xff]   ;;  %v218_v29 = vsel %vm216_vm1, %v902_v26, 0 }
  0x19   :  { %229 = vmatprep.subr.bf16.mxu0 %v885_v6  ;;  %476 = vmatprep.subr.bf16.mxu1 %v921_v20  ;;  %v903_v30 = vld [vmem:[#allocation2 + $0xb4] ss:$8 sps:$4 sm:$0xff]   ;;  %v905_v31 = vld [vmem:[#allocation2 + $0xb0] ss:$8 sps:$4 sm:$0xff]   ;;  %v930_v33 = vld [vmem:[%s1315_s3 + $0x24] ss:$8 sps:$4 sm:$0xff]  }
  0x1a   :  { %v929_v32 = vld [vmem:[%s1315_s3 + $0x30] ss:$8 sps:$4 sm:$0xff]   ;;  %v906_v34 = vld [vmem:[#allocation2 + $0xa4] ss:$8 sps:$4 sm:$0xff]   ;;  %v932_v35 = vld [vmem:[%s1315_s3 + $0x20] ss:$8 sps:$4 sm:$0xff]  }
  0x1b   :  { %v908_v36 = vld [vmem:[#allocation2 + $0xa0] ss:$8 sps:$4 sm:$0xff]   ;;  %v933_v37 = vld [vmem:[%s1315_s3 + $0x14] ss:$8 sps:$4 sm:$0xff]   ;;  %v935_v39 = vld [vmem:[%s1315_s3 + $0x10] ss:$8 sps:$4 sm:$0xff]  }
  0x1c   :  { %230 = vmatpush1.bf16.msra.mxu0 %v887_v7  ;;  %477 = vmatpush1.bf16.msra.mxu1 %v923_v24  ;;  %v909_v38 = vld [vmem:[#allocation2 + $0x94] ss:$8 sps:$4 sm:$0xff]   ;;  %v911_v40 = vld [vmem:[#allocation2 + $0x90] ss:$8 sps:$4 sm:$0xff]   ;;  %v936_v41 = vld [vmem:[%s1315_s3 + $0x4] ss:$8 sps:$4 sm:$0xff]  }
  0x1d   :  { %231 = vmatprep.subr.bf16.mxu0 %v888_v8  ;;  %478 = vmatprep.subr.bf16.mxu1 %v924_v25  ;;  %v912_v42 = vld [vmem:[#allocation2 + $0x84] ss:$8 sps:$4 sm:$0xff]   ;;  %v938_v43 = vld [vmem:[%s1315_s3] ss:$8 sps:$4 sm:$0xff]   ;;  %v939_v46 = vld [vmem:[%s1315_s3 + $0xf4] ss:$8 sps:$4 sm:$0xff]  }
  0x1e   :  { %v914_v44 = vld [vmem:[#allocation2 + $0x80] ss:$8 sps:$4 sm:$0xff]   ;;  %v941_v48 = vld [vmem:[%s1315_s3 + $0xf0] ss:$8 sps:$4 sm:$0xff]   ;;  %v942_v49 = vld [vmem:[%s1315_s3 + $0xe4] ss:$8 sps:$4 sm:$0xff]  }
  0x1f   :  { %v42_v45 = vld [vmem:[%s1312_s0] sm:$0xff]  ;;  %v945_v51 = vld [vmem:[%s1315_s3 + $0xd4] ss:$8 sps:$4 sm:$0xff]   ;;  %v947_v52 = vld [vmem:[%s1315_s3 + $0xd0] ss:$8 sps:$4 sm:$0xff]  }
  0x20   :  { %232 = vmatpush1.bf16.msra.mxu0 %v890_v9  ;;  %479 = vmatpush1.bf16.msra.mxu1 %v926_v27  ;;  %v44_v47 = vpack.c.bf16 %v42_v45, %v42_v45  ;;  %v944_v50 = vld [vmem:[%s1315_s3 + $0xe0] ss:$8 sps:$4 sm:$0xff]   ;;  %v948_v53 = vld [vmem:[%s1315_s3 + $0xc4] ss:$8 sps:$4 sm:$0xff]   ;;  %v951_v55 = vld [vmem:[%s1315_s3 + $0xb4] ss:$8 sps:$4 sm:$0xff]   ;;  %v74_v27 = vlaneseq }
  0x21   :  { %233 = vmatprep.subr.bf16.mxu0 %v891_v10  ;;  %480 = vmatprep.subr.bf16.mxu1 %v927_v28  ;;  %v950_v54 = vld [vmem:[%s1315_s3 + $0xc0] ss:$8 sps:$4 sm:$0xff]   ;;  %v953_v56 = vld [vmem:[%s1315_s3 + $0xb0] ss:$8 sps:$4 sm:$0xff]   ;;  %v954_v57 = vld [vmem:[%s1315_s3 + $0xa4] ss:$8 sps:$4 sm:$0xff]  }
  0x22   :  { %v956_v58 = vld [vmem:[%s1315_s3 + $0xa0] ss:$8 sps:$4 sm:$0xff]   ;;  %v957_v59 = vld [vmem:[%s1315_s3 + $0x94] ss:$8 sps:$4 sm:$0xff]   ;;  %v959_v60 = vld [vmem:[%s1315_s3 + $0x90] ss:$8 sps:$4 sm:$0xff]  }
  0x23   :  { %v960_v61 = vld [vmem:[%s1315_s3 + $0x84] ss:$8 sps:$4 sm:$0xff]   ;;  %v962_v62 = vld [vmem:[%s1315_s3 + $0x80] ss:$8 sps:$4 sm:$0xff]   ;;  %v963_v63 = vld [vmem:[%s1317_s5 + $0x70] ss:$8 sps:$4 sm:$0xff]  }
  0x24   :  { %234 = vmatpush1.bf16.msra.mxu0 %v893_v11  ;;  %481 = vmatpush1.bf16.msra.mxu1 %v929_v32  ;;  %v965_v0 = vld [vmem:[%s1317_s5 + $0x74] ss:$8 sps:$4 sm:$0xff]   ;;  %v968_v1 = vld [vmem:[%s1317_s5 + $0x64] ss:$8 sps:$4 sm:$0xff]   ;;  %v966_v2 = vld [vmem:[%s1317_s5 + $0x60] ss:$8 sps:$4 sm:$0xff]  }
  0x25   :  { %235 = vmatprep.subr.bf16.mxu0 %v894_v16  ;;  %482 = vmatprep.subr.bf16.mxu1 %v930_v33  ;;  %v971_v3 = vld [vmem:[%s1317_s5 + $0x54] ss:$8 sps:$4 sm:$0xff]   ;;  %v969_v4 = vld [vmem:[%s1317_s5 + $0x50] ss:$8 sps:$4 sm:$0xff]   ;;  %v974_v5 = vld [vmem:[%s1317_s5 + $0x44] ss:$8 sps:$4 sm:$0xff]  }
  0x26   :  { %v972_v6 = vld [vmem:[%s1317_s5 + $0x40] ss:$8 sps:$4 sm:$0xff]   ;;  %v977_v7 = vld [vmem:[%s1317_s5 + $0x34] ss:$8 sps:$4 sm:$0xff]   ;;  %v975_v8 = vld [vmem:[%s1317_s5 + $0x30] ss:$8 sps:$4 sm:$0xff]  }
  0x27   :  { %v980_v9 = vld [vmem:[%s1317_s5 + $0x24] ss:$8 sps:$4 sm:$0xff]   ;;  %v978_v10 = vld [vmem:[%s1317_s5 + $0x20] ss:$8 sps:$4 sm:$0xff]   ;;  %v983_v11 = vld [vmem:[%s1317_s5 + $0x14] ss:$8 sps:$4 sm:$0xff]  }
  0x28   :  { %236 = vmatpush1.bf16.msra.mxu0 %v896_v18  ;;  %483 = vmatpush1.bf16.msra.mxu1 %v932_v35  ;;  %v981_v12 = vld [vmem:[%s1317_s5 + $0x10] ss:$8 sps:$4 sm:$0xff]   ;;  %v986_v13 = vld [vmem:[%s1317_s5 + $0x4] ss:$8 sps:$4 sm:$0xff]   ;;  %v984_v14 = vld [vmem:[%s1317_s5] ss:$8 sps:$4 sm:$0xff]  }
  0x29   :  { %237 = vmatprep.subr.bf16.mxu0 %v897_v21  ;;  %484 = vmatprep.subr.bf16.mxu1 %v933_v37  ;;  %v989_v15 = vld [vmem:[%s1317_s5 + $0xf4] ss:$8 sps:$4 sm:$0xff]   ;;  %v987_v16 = vld [vmem:[%s1317_s5 + $0xf0] ss:$8 sps:$4 sm:$0xff]   ;;  %v992_v17 = vld [vmem:[%s1317_s5 + $0xe4] ss:$8 sps:$4 sm:$0xff]  }
  0x2a   :  { %v990_v18 = vld [vmem:[%s1317_s5 + $0xe0] ss:$8 sps:$4 sm:$0xff]   ;;  %v995_v19 = vld [vmem:[%s1317_s5 + $0xd4] ss:$8 sps:$4 sm:$0xff]   ;;  %v993_v20 = vld [vmem:[%s1317_s5 + $0xd0] ss:$8 sps:$4 sm:$0xff]  }
  0x2b   :  { %v998_v21 = vld [vmem:[%s1317_s5 + $0xc4] ss:$8 sps:$4 sm:$0xff]   ;;  %v999_v24 = vld [vmem:[%s1317_s5 + $0xb0] ss:$8 sps:$4 sm:$0xff]   ;;  %v1002_v26 = vld [vmem:[%s1317_s5 + $0xa0] ss:$8 sps:$4 sm:$0xff]  }
  0x2c   :  { %238 = vmatpush1.bf16.msra.mxu0 %v899_v22  ;;  %485 = vmatpush1.bf16.msra.mxu1 %v935_v39  ;;  %v996_v22 = vld [vmem:[%s1317_s5 + $0xc0] ss:$8 sps:$4 sm:$0xff]   ;;  %v1004_v25 = vld [vmem:[%s1317_s5 + $0xa4] ss:$8 sps:$4 sm:$0xff]   ;;  %v75_v28 = vshrl.u32 %v74_v27, 7 }
  0x2d   :  { %806 = vmatprep.subr.msk.bf16.mxu0 %vm216_vm1, %v900_v23  ;;  %486 = vmatprep.subr.bf16.mxu1 %v936_v41  ;;  %v1001_v23 = vld [vmem:[%s1317_s5 + $0xb4] ss:$8 sps:$4 sm:$0xff]   ;;  %v1005_v45 = vld [vmem:[%s1317_s5 + $0x90] ss:$8 sps:$4 sm:$0xff]  }
  0x30   :  { %246 = vmatpush2.bf16.msra.mxu0 %v218_v29  ;;  %487 = vmatpush1.bf16.msra.mxu1 %v938_v43  ;;  %v76_v29 = vsub.s32 0, %v75_v28 }
  0x31   :  { %247 = vmatprep.subr.bf16.mxu0 %v903_v30  ;;  %488 = vmatprep.subr.bf16.mxu1 %v939_v46  ;;  %v72_v30 = vld [vmem:[%s1314_s2] sm:$0x3]  ;;  %v1010_v46 = vld [vmem:[%s1317_s5 + $0x84] ss:$8 sps:$4 sm:$0xff]  }
  0x32   :  { %v77_v32 = vrot.slane %v72_v30, %v76_v29 }
  0x34   :  { %248 = vmatpush2.bf16.msra.mxu0 %v905_v31  ;;  %489 = vmatpush2.bf16.msra.mxu1 %v941_v48  ;;  %v80_v31 = vsub.s32 1, %v75_v28  ;;  %v300_v48 = vld [vmem:[%s1316_s4] sm:$0x3]  ;;  %s1058_s4 = smov [#allocation5]  }
  0x35   :  { %249 = vmatprep.subr.bf16.mxu0 %v906_v34  ;;  %490 = vmatprep.subr.bf16.mxu1 %v942_v49  ;;  %v305_v49 = vrot.slane %v300_v48, %v76_v29  ;;  %s771_s16 = sshll.u32 %s1058_s4, 4  ;;  %s772_s16 = int_to_ptr.vmem [resolvable:$true] %s771_s16 }
  0x36   :  { %v81_v33 = vrot.slane %v72_v30, %v80_v31  ;;  %s1031_s17 = scalar_lea.vmem %s772_s16, 256  ;;  %p1036_p6 = scmp.lt.s32.totalorder %s772_s16, %s772_s16 }
  0x37   :  { %p1032_p5 = scmp.ne.s32.totalorder %s772_s16, %s1031_s17  ;;  %p1037_p7 = scmp.lt.s32.totalorder %s1031_s17, %s1031_s17 }
  0x38   :  { %250 = vmatpush2.bf16.msra.mxu0 %v908_v36  ;;  %491 = vmatpush2.bf16.msra.mxu1 %v944_v50  ;;  %v309_v50 = vrot.slane %v300_v48, %v80_v31 }
  0x39   :  { %251 = vmatprep.subr.bf16.mxu0 %v909_v38  ;;  %492 = vmatprep.subr.bf16.mxu1 %v945_v51  ;;  %p1038_p8 = por %p1037_p7, %p1036_p6 }
  0x3b   :  { %p1039_p9 = pnand %p1038_p8, %p1032_p5 }
  0x3c   :  { %252 = vmatpush2.bf16.msra.mxu0 %v911_v40  ;;  %493 = vmatpush2.bf16.msra.mxu1 %v947_v52 }
  0x3d   :  { %253 = vmatprep.subr.bf16.mxu0 %v912_v42  ;;  %494 = vmatprep.subr.bf16.mxu1 %v948_v53 }
  0x40   :  { %254 = vmatpush2.bf16.msra.mxu0 %v914_v44  ;;  %495 = vmatpush2.bf16.msra.mxu1 %v950_v54  ;;  %v1007_v44 = vld [vmem:[%s1317_s5 + $0x94] ss:$8 sps:$4 sm:$0xff]  }
  0x41   :  { %496 = vmatprep.subr.bf16.mxu1 %v951_v55  ;;  %721 = vmatprep.subr.bf16.mxu0 %v965_v0 }
  0x43   :  { %256 = vmatmul.mubr.bf16.vlgmr.msra.gmra.mxu0 %v44_v47  ;;  %v1008_v47 = vld [vmem:[%s1317_s5 + $0x80] ss:$8 sps:$4 sm:$0xff]  }
  0x44   :  { %497 = vmatpush2.bf16.msra.mxu1 %v953_v56  ;;  %722 = vmatpush1.bf16.msra.mxu0 %v963_v63 }
  0x45   :  { %498 = vmatprep.subr.bf16.mxu1 %v954_v57  ;;  %723 = vmatprep.subr.bf16.mxu0 %v968_v1 }
  0x48   :  { %499 = vmatpush2.bf16.msra.mxu1 %v956_v58  ;;  %724 = vmatpush1.bf16.msra.mxu0 %v966_v2 }
  0x49   :  { %500 = vmatprep.subr.bf16.mxu1 %v957_v59  ;;  %725 = vmatprep.subr.bf16.mxu0 %v971_v3 }
  0x4c   :  { %501 = vmatpush2.bf16.msra.mxu1 %v959_v60  ;;  %726 = vmatpush1.bf16.msra.mxu0 %v969_v4 }
  0x4d   :  { %502 = vmatprep.subr.bf16.mxu1 %v960_v61  ;;  %727 = vmatprep.subr.bf16.mxu0 %v974_v5  ;;  %v549_v61 = vld [vmem:[%s1318_s6] sm:$0x3] }
  0x4e   :  { %v558_v63 = vrot.slane %v549_v61, %v80_v31 }
  0x50   :  { %503 = vmatpush2.bf16.msra.mxu1 %v962_v62  ;;  %728 = vmatpush1.bf16.msra.mxu0 %v972_v6  ;;  %v554_v62 = vrot.slane %v549_v61, %v76_v29 }
  0x51   :  { %729 = vmatprep.subr.bf16.mxu0 %v977_v7 }
  0x54   :  { %730 = vmatpush1.bf16.msra.mxu0 %v975_v8 }
  0x55   :  { %731 = vmatprep.subr.bf16.mxu0 %v980_v9 }
  0x58   :  { %732 = vmatpush1.bf16.msra.mxu0 %v978_v10 }
  0x59   :  { %733 = vmatprep.subr.bf16.mxu0 %v983_v11 }
  0x5c   :  { %734 = vmatpush1.bf16.msra.mxu0 %v981_v12 }
  0x5d   :  { %735 = vmatprep.subr.bf16.mxu0 %v986_v13 }
  0x60   :  { %736 = vmatpush1.bf16.msra.mxu0 %v984_v14 }
  0x61   :  { %737 = vmatprep.subr.bf16.mxu0 %v989_v15 }
  0x64   :  { %738 = vmatpush2.bf16.msra.mxu0 %v987_v16 }
  0x65   :  { %739 = vmatprep.subr.bf16.mxu0 %v992_v17 }
  0x68   :  { %740 = vmatpush2.bf16.msra.mxu0 %v990_v18 }
  0x69   :  { %741 = vmatprep.subr.bf16.mxu0 %v995_v19 }
  0x6c   :  { %742 = vmatpush2.bf16.msra.mxu0 %v993_v20 }
  0x6d   :  { %743 = vmatprep.subr.bf16.mxu0 %v998_v21 }
  0x70   :  { %744 = vmatpush2.bf16.msra.mxu0 %v996_v22 }
  0x71   :  { %745 = vmatprep.subr.bf16.mxu0 %v1001_v23 }
  0x74   :  { %746 = vmatpush2.bf16.msra.mxu0 %v999_v24 }
  0x75   :  { %747 = vmatprep.subr.bf16.mxu0 %v1004_v25 }
  0x78   :  { %748 = vmatpush2.bf16.msra.mxu0 %v1002_v26 }
  0x79   :  { %749 = vmatprep.subr.bf16.mxu0 %v1007_v44 }
  0x7c   :  { %750 = vmatpush2.bf16.msra.mxu0 %v1005_v45 }
  0x7d   :  { %751 = vmatprep.subr.bf16.mxu0 %v1010_v46 }
  0x80   :  { %752 = vmatpush2.bf16.msra.mxu0 %v1008_v47 }
 0x103   :  { %v257_v34 = vpop.f32.mrf.mxu0 }
 0x104   :  { %v258_v35 = vadd.f32 %v257_v34, %v77_v32 }
 0x105   :  { %v259_v36 = vpop.f32.mrf.mxu0 }
 0x106   :  { %v260_v37 = vadd.f32 %v259_v36, %v81_v33  ;;  %v264_v38 = vmax.f32 %v258_v35, 0.0 }
 0x107   :  { %v261_v39 = vpop.f32.mrf.mxu0 }
 0x108   :  { %v265_v40 = vmax.f32 %v260_v37, 0.0  ;;  %v266_v43 = vpack.c.bf16 %v264_v38, %v264_v38 }
 0x109   :  { %v262_v41 = vpop.f32.mrf.mxu0 }
 0x10a   :  { %v267_v42 = vpack.c.bf16 %v265_v40, %v265_v40 }
 0x10c   :  { %504 = vmatprep.mubr.bf16.mxu1 %v267_v42 }
 0x10d   :  { %505 = vmatmul.mubr.bf16.vlgmr.msra.gmra.mxu1 %v266_v43 }
 0x1cd   :  { %v506_v51 = vpop.f32.mrf.mxu1 }
 0x1ce   :  { %v507_v52 = vadd.f32 %v506_v51, %v305_v49 }
 0x1cf   :  { %v508_v53 = vpop.f32.mrf.mxu1 }
 0x1d0   :  { %v509_v54 = vadd.f32 %v508_v53, %v309_v50  ;;  %v513_v55 = vmax.f32 %v507_v52, 0.0 }
 0x1d1   :  { %v510_v56 = vpop.f32.mrf.mxu1 }
 0x1d2   :  { %v514_v57 = vmax.f32 %v509_v54, 0.0  ;;  %v515_v60 = vpack.c.bf16 %v513_v55, %v513_v55 }
 0x1d3   :  { %v511_v58 = vpop.f32.mrf.mxu1 }
 0x1d4   :  { %v516_v59 = vpack.c.bf16 %v514_v57, %v514_v57 }
 0x1d6   :  { %753 = vmatprep.mubr.bf16.mxu0 %v516_v59 }
 0x1d7   :  { %754 = vmatmul.mubr.bf16.vlgmr.msra.gmra.mxu0 %v515_v60 }
 0x297   :  { %v755_v0 = vpop.f32.mrf.mxu0 }
 0x298   :  { %v756_v1 = vadd.f32 %v755_v0, %v554_v62 }
 0x299   :  { %v757_v2 = vpop.f32.mrf.mxu0 }
 0x29a   :  { %762 = vst [vmem:[#allocation5] sm:$0xff] %v756_v1  ;;  %v758_v3 = vadd.f32 %v757_v2, %v558_v63 }
 0x29b   :  { %v759_v4 = vpop.f32.mrf.mxu0 }
 0x29c   :  { %764 = vst.msk [vmem:[#allocation5 + $0x8] sm:$0xff] %vm763_vm2, %v758_v3 }
 0x29d   :  { %v760_v5 = vpop.f32.mrf.mxu0 }
 0x29e   :  { %1042 = shalt.err (!%p1039_p9)
}
 0x29f   :  { %774 = dma.vmem_to_hbm [thread:$0]  %s772_s16, 256, %s1319_s7, [#allocation4]  }
 0x2a0   :  { %1053 = dma.done.wait [#allocation4], 256  }
 0x2a1   :  { %1054 = vsyncadd [#allocation4], 4294967040 }
 0x2a2   :  { %778 = vsyncpa [#allocation3], 1 }
 0x2a3   :  { %779 = vsyncpa [#allocation4], 1 }

</bundles_post_ra>
